<compile_context>
chip_gen: v6e
topology: v6e:2x2x1
jax: 0.10.0
libtpu: 0.0.40
codegen_flags: <defaults>
</compile_context>

<pallas_src>
import math

import jax
import jax.numpy as jnp
from jax.experimental import pallas as pl
from jax.experimental.pallas import tpu as pltpu

# ----------------------------- model config ---------------------------------
B = 2          # batch
L = 8          # sequence length
D_MODEL = 32
D_INNER = 64
N_HEAD = 2
D_K = 16
D_V = 16
EPS = 1e-6
TEMPERATURE = D_K ** 0.5

BL = B * L

# packed weight-slab column layout: [ Wq/temp | Wk | Wv | Wfc | W1 ]
QKV_W = 3 * N_HEAD * D_K            # 96
K_OFF = N_HEAD * D_K                # 32
V_OFF = 2 * N_HEAD * D_K            # 64
FC_OFF = QKV_W                      # 96   (fc weight cols 96:128)
W1_OFF = FC_OFF + D_MODEL           # 128  (w1 cols 128:192)
W_MAIN_COLS = W1_OFF + D_INNER      # 192

# bias slab rows (shape (8, 64), short rows zero padded)
R_LN1_G, R_LN1_B, R_LN2_G, R_LN2_B, R_FC_B, R_B2, R_B1 = 0, 1, 2, 3, 4, 5, 6
BIAS_ROWS, BIAS_COLS = 8, D_INNER


# ------------------------------- kernel -------------------------------------
def encoder_layer_kernel(x_ref, w_main_ref, w2_ref, bias_ref, out_ref, attn_ref):
    x = x_ref[...]                      # (B*L, D)
    w = w_main_ref[...]                 # (D, 192) packed weights
    bias = bias_ref[...]                # (8, 64)  packed LN scales / biases

    def layer_norm(t, g, b):
        mu = jnp.mean(t, axis=-1, keepdims=True)
        var = jnp.mean((t - mu) ** 2, axis=-1, keepdims=True)
        return (t - mu) * jax.lax.rsqrt(var + EPS) * g + b

    # ---------------- multi-head self-attention (pre-norm) ------------------
    residual = x
    xn = layer_norm(x,
                    bias[R_LN1_G:R_LN1_G + 1, :D_MODEL],
                    bias[R_LN1_B:R_LN1_B + 1, :D_MODEL])

    # fused Q|K|V projection: one lane-dense MXU pass (1/temperature already
    # folded into the Q columns of the packed weight).
    qkv = jnp.dot(xn, w[:, :QKV_W], preferred_element_type=jnp.float32)  # (B*L, 96)
    qkv3 = qkv.reshape(B, L, QKV_W)                                      # (B, L, 96)

    fc_w = w[:, FC_OFF:FC_OFF + D_MODEL]                                 # (H*dv, D)

    mha = None
    for h in range(N_HEAD):             # static unroll; batched over B inside
        qh = qkv3[:, :, h * D_K:(h + 1) * D_K]                    # (B, L, dk)
        kh = qkv3[:, :, K_OFF + h * D_K:K_OFF + (h + 1) * D_K]    # (B, L, dk)
        vh = qkv3[:, :, V_OFF + h * D_V:V_OFF + (h + 1) * D_V]    # (B, L, dv)

        s = jnp.einsum('bqd,bkd->bqk', qh, kh,
                       preferred_element_type=jnp.float32)        # (B, L, L)
        s = s - jnp.max(s, axis=-1, keepdims=True)
        e = jnp.exp(s)
        a = e * pl.reciprocal(jnp.sum(e, axis=-1, keepdims=True), approx=True)
        attn_ref[h] = a                                           # (B, L, L)

        oh = jnp.einsum('bqk,bkd->bqd', a, vh,
                        preferred_element_type=jnp.float32)       # (B, L, dv)
        # fc applied per head block and summed == concat(heads) @ fc_w
        contrib = jnp.dot(oh.reshape(BL, D_V),
                          fc_w[h * D_V:(h + 1) * D_V, :],
                          preferred_element_type=jnp.float32)     # (B*L, D)
        mha = contrib if mha is None else mha + contrib

    o = mha + bias[R_FC_B:R_FC_B + 1, :D_MODEL] + residual        # (B*L, D)

    # ---------------- position-wise feed-forward (pre-norm) -----------------
    residual2 = o
    on = layer_norm(o,
                    bias[R_LN2_G:R_LN2_G + 1, :D_MODEL],
                    bias[R_LN2_B:R_LN2_B + 1, :D_MODEL])
    h1 = jnp.dot(on, w[:, W1_OFF:W1_OFF + D_INNER],
                 preferred_element_type=jnp.float32) \
        + bias[R_B1:R_B1 + 1, :D_INNER]                           # (B*L, D_INNER)
    # exact GELU (matches F.gelu default, erf-based)
    g = 0.5 * h1 * (1.0 + jax.lax.erf(h1 * (1.0 / math.sqrt(2.0))))
    y = jnp.dot(g, w2_ref[...], preferred_element_type=jnp.float32) \
        + bias[R_B2:R_B2 + 1, :D_MODEL]

    out_ref[...] = y + residual2


# ------------------------------- wrapper -------------------------------------
def _pack_params(params):
    (ln1_g, ln1_b, wq, wk, wv, fc_w, fc_b,
     ln2_g, ln2_b, w1, b1, w2, b2) = params

    # one (D, 192) weight slab; 1/temperature folded into the Q columns
    w_main = jnp.concatenate(
        [wq * (1.0 / TEMPERATURE), wk, wv, fc_w, w1], axis=1)

    def row(v):
        v = jnp.reshape(v, (-1,)).astype(jnp.float32)
        return jnp.pad(v, (0, BIAS_COLS - v.shape[0]))

    bias = jnp.stack(
        [row(ln1_g), row(ln1_b), row(ln2_g), row(ln2_b),
         row(fc_b), row(b2), row(b1), jnp.zeros((BIAS_COLS,), jnp.float32)],
        axis=0)                                                    # (8, 64)
    return w_main, w2, bias


@jax.jit
def encoder_layer(x, params):
    b, l, d = x.shape
    w_main, w2, bias = _pack_params(params)
    x2 = x.reshape(b * l, d)                      # lane-dense (B*L, D) slab

    out_shape = (
        jax.ShapeDtypeStruct((b * l, d), jnp.float32),
        jax.ShapeDtypeStruct((N_HEAD, b, l, l), jnp.float32),
    )
    in_specs = [
        pl.BlockSpec((b * l, d), lambda i: (0, 0)),
        pl.BlockSpec(w_main.shape, lambda i: (0, 0)),
        pl.BlockSpec(w2.shape, lambda i: (0, 0)),
        pl.BlockSpec(bias.shape, lambda i: (0, 0)),
    ]
    out_specs = (
        pl.BlockSpec((b * l, d), lambda i: (0, 0)),
        pl.BlockSpec((N_HEAD, b, l, l), lambda i: (0, 0, 0, 0)),
    )

    out2, attn_hb = pl.pallas_call(
        encoder_layer_kernel,
        grid=(1,),                                 # single step: whole problem
        in_specs=in_specs,
        out_specs=out_specs,
        out_shape=out_shape,
        compiler_params=pltpu.CompilerParams(
            dimension_semantics=("arbitrary",)),
    )(x2, w_main, w2, bias)

    enc_out = out2.reshape(b, l, d)
    enc_attn = jnp.transpose(attn_hb, (1, 0, 2, 3))   # (B, H, L, L)
    return enc_out, enc_attn


# --------------------------- deterministic params ----------------------------
def xavier_uniform(key, shape):
    fan_in, fan_out = shape
    limit = math.sqrt(6.0 / (fan_in + fan_out))
    return jax.random.uniform(key, shape, jnp.float32, -limit, limit)


def make_params(key):
    ks = jax.random.split(key, 8)
    ln1_g = jnp.ones((D_MODEL,), jnp.float32)
    ln1_b = jnp.zeros((D_MODEL,), jnp.float32)
    wq = xavier_uniform(ks[0], (D_MODEL, N_HEAD * D_K))
    wk = xavier_uniform(ks[1], (D_MODEL, N_HEAD * D_K))
    wv = xavier_uniform(ks[2], (D_MODEL, N_HEAD * D_V))
    fc_w = xavier_uniform(ks[3], (N_HEAD * D_V, D_MODEL))
    fc_b = jnp.zeros((D_MODEL,), jnp.float32)
    ln2_g = jnp.ones((D_MODEL,), jnp.float32)
    ln2_b = jnp.zeros((D_MODEL,), jnp.float32)
    w1 = xavier_uniform(ks[4], (D_MODEL, D_INNER))
    b1 = 0.01 * jax.random.normal(ks[5], (D_INNER,), jnp.float32)
    w2 = xavier_uniform(ks[6], (D_INNER, D_MODEL))
    b2 = 0.01 * jax.random.normal(ks[7], (D_MODEL,), jnp.float32)
    return (ln1_g, ln1_b, wq, wk, wv, fc_w, fc_b,
            ln2_g, ln2_b, w1, b1, w2, b2)


# ---------------------------------- main -------------------------------------
if __name__ == "__main__":
    key = jax.random.PRNGKey(0)
    k_x, k_p = jax.random.split(key)
    x = jax.random.normal(k_x, (B, L, D_MODEL), jnp.float32)
    params = make_params(k_p)

    enc_out, enc_attn = encoder_layer(x, params)
    jax.block_until_ready((enc_out, enc_attn))

    assert enc_out.shape == (B, L, D_MODEL)
    assert enc_attn.shape == (B, N_HEAD, L, L)
    print("KERNEL_OK")
</pallas_src>

<mosaic_0001>
module attributes {stable_mosaic.version = 11 : i64} {
  func.func @encoder_layer_kernel(%arg0: i32, %arg1: memref<16x32xf32, #tpu.memory_space<vmem>>, %arg2: memref<32x192xf32, #tpu.memory_space<vmem>>, %arg3: memref<64x32xf32, #tpu.memory_space<vmem>>, %arg4: memref<8x64xf32, #tpu.memory_space<vmem>>, %arg5: memref<16x32xf32, #tpu.memory_space<vmem>>, %arg6: memref<2x2x8x8xf32, #tpu.memory_space<vmem>>) attributes {dimension_semantics = [#tpu.dimension_semantics<arbitrary>], iteration_bounds = array<i64: 1>, scalar_prefetch = 0 : i64, scratch_operands = 0 : i64, tpu.core_type = #tpu.core_type<tc>, window_params = [{pipeline_mode = #tpu.pipeline_mode<synchronous>, transform_indices = @transform_0, window_bounds = array<i64: 16, 32>}, {pipeline_mode = #tpu.pipeline_mode<synchronous>, transform_indices = @transform_1, window_bounds = array<i64: 32, 192>}, {pipeline_mode = #tpu.pipeline_mode<synchronous>, transform_indices = @transform_2, window_bounds = array<i64: 64, 32>}, {pipeline_mode = #tpu.pipeline_mode<synchronous>, transform_indices = @transform_3, window_bounds = array<i64: 8, 64>}, {pipeline_mode = #tpu.pipeline_mode<synchronous>, transform_indices = @transform_4, window_bounds = array<i64: 16, 32>}, {pipeline_mode = #tpu.pipeline_mode<synchronous>, transform_indices = @transform_5, window_bounds = array<i64: 2, 2, 8, 8>}]} {
    %c0 = arith.constant 0 : index
    %c0_0 = arith.constant 0 : index
    %0 = vector.load %arg1[%c0, %c0_0] : memref<16x32xf32, #tpu.memory_space<vmem>>, vector<16x32xf32>
    %c0_1 = arith.constant 0 : index
    %c0_2 = arith.constant 0 : index
    %1 = vector.load %arg2[%c0_1, %c0_2] : memref<32x192xf32, #tpu.memory_space<vmem>>, vector<32x192xf32>
    %c0_3 = arith.constant 0 : index
    %c0_4 = arith.constant 0 : index
    %2 = vector.load %arg4[%c0_3, %c0_4] : memref<8x64xf32, #tpu.memory_space<vmem>>, vector<8x64xf32>
    %3 = vector.extract_strided_slice %2 {offsets = [0, 0], sizes = [1, 32], strides = [1, 1]} : vector<8x64xf32> to vector<1x32xf32>
    %4 = vector.extract_strided_slice %2 {offsets = [1, 0], sizes = [1, 32], strides = [1, 1]} : vector<8x64xf32> to vector<1x32xf32>
    %cst = arith.constant dense<0.000000e+00> : vector<16xf32>
    %5 = vector.multi_reduction <add>, %0, %cst [1] : vector<16x32xf32> to vector<16xf32>
    %6 = vector.shape_cast %5 : vector<16xf32> to vector<16x1xf32>
    %cst_5 = arith.constant 3.200000e+01 : f32
    %7 = vector.broadcast %cst_5 : f32 to vector<16x1xf32>
    %8 = arith.divf %6, %7 : vector<16x1xf32>
    %9 = vector.broadcast %8 : vector<16x1xf32> to vector<16x32xf32>
    %10 = arith.subf %0, %9 : vector<16x32xf32>
    %11 = arith.mulf %10, %10 : vector<16x32xf32>
    %cst_6 = arith.constant dense<0.000000e+00> : vector<16xf32>
    %12 = vector.multi_reduction <add>, %11, %cst_6 [1] : vector<16x32xf32> to vector<16xf32>
    %13 = vector.shape_cast %12 : vector<16xf32> to vector<16x1xf32>
    %cst_7 = arith.constant 3.200000e+01 : f32
    %14 = vector.broadcast %cst_7 : f32 to vector<16x1xf32>
    %15 = arith.divf %13, %14 : vector<16x1xf32>
    %16 = vector.broadcast %8 : vector<16x1xf32> to vector<16x32xf32>
    %17 = arith.subf %0, %16 : vector<16x32xf32>
    %cst_8 = arith.constant 9.99999997E-7 : f32
    %18 = vector.broadcast %cst_8 : f32 to vector<16x1xf32>
    %19 = arith.addf %15, %18 : vector<16x1xf32>
    %20 = math.rsqrt %19 : vector<16x1xf32>
    %21 = vector.broadcast %20 : vector<16x1xf32> to vector<16x32xf32>
    %22 = arith.mulf %17, %21 : vector<16x32xf32>
    %23 = vector.broadcast %3 : vector<1x32xf32> to vector<16x32xf32>
    %24 = arith.mulf %22, %23 : vector<16x32xf32>
    %25 = vector.broadcast %4 : vector<1x32xf32> to vector<16x32xf32>
    %26 = arith.addf %24, %25 : vector<16x32xf32>
    %27 = vector.extract_strided_slice %1 {offsets = [0, 0], sizes = [32, 96], strides = [1, 1]} : vector<32x192xf32> to vector<32x96xf32>
    %cst_9 = arith.constant dense<0.000000e+00> : vector<16x96xf32>
    %28 = tpu.matmul %26, %27, %cst_9 {dimension_numbers = #tpu.dot_dimension_numbers<[1], [0], [0], [1], [0, 0, 1, 1], [], []>} : vector<16x32xf32>, vector<32x96xf32>, vector<16x96xf32> -> vector<16x96xf32>
    %29 = vector.shape_cast %28 : vector<16x96xf32> to vector<2x8x96xf32>
    %30 = vector.extract_strided_slice %1 {offsets = [0, 96], sizes = [32, 32], strides = [1, 1]} : vector<32x192xf32> to vector<32x32xf32>
    %31 = vector.extract_strided_slice %29 {offsets = [0, 0, 0], sizes = [2, 8, 16], strides = [1, 1, 1]} : vector<2x8x96xf32> to vector<2x8x16xf32>
    %32 = vector.extract_strided_slice %29 {offsets = [0, 0, 32], sizes = [2, 8, 16], strides = [1, 1, 1]} : vector<2x8x96xf32> to vector<2x8x16xf32>
    %33 = vector.extract_strided_slice %29 {offsets = [0, 0, 64], sizes = [2, 8, 16], strides = [1, 1, 1]} : vector<2x8x96xf32> to vector<2x8x16xf32>
    "tpu.trace_start"() <{level = 10 : i32, message = "bqd,bkd->bqk"}> : () -> ()
    %cst_10 = arith.constant dense<0.000000e+00> : vector<2x8x8xf32>
    %34 = tpu.matmul %31, %32, %cst_10 {dimension_numbers = #tpu.dot_dimension_numbers<[2], [2], [1], [1], [0, 0, 0, 1, 1, 1], [0], [0]>} : vector<2x8x16xf32>, vector<2x8x16xf32>, vector<2x8x8xf32> -> vector<2x8x8xf32>
    "tpu.trace_stop"() : () -> ()
    %cst_11 = arith.constant dense<0xFF800000> : vector<2x8xf32>
    %35 = vector.multi_reduction <maximumf>, %34, %cst_11 [2] : vector<2x8x8xf32> to vector<2x8xf32>
    %36 = vector.shape_cast %35 : vector<2x8xf32> to vector<2x8x1xf32>
    %37 = vector.broadcast %36 : vector<2x8x1xf32> to vector<2x8x8xf32>
    %38 = arith.subf %34, %37 : vector<2x8x8xf32>
    %39 = math.exp %38 : vector<2x8x8xf32>
    %cst_12 = arith.constant dense<0.000000e+00> : vector<2x8xf32>
    %40 = vector.multi_reduction <add>, %39, %cst_12 [2] : vector<2x8x8xf32> to vector<2x8xf32>
    %41 = vector.shape_cast %40 : vector<2x8xf32> to vector<2x8x1xf32>
    %42 = tpu.reciprocal %41 {approx = true} : vector<2x8x1xf32> -> vector<2x8x1xf32>
    %43 = vector.broadcast %42 : vector<2x8x1xf32> to vector<2x8x8xf32>
    %44 = arith.mulf %39, %43 : vector<2x8x8xf32>
    %c0_13 = arith.constant 0 : index
    %c0_14 = arith.constant 0 : index
    %c0_15 = arith.constant 0 : index
    %c0_16 = arith.constant 0 : index
    %45 = vector.load %arg6[%c0_13, %c0_14, %c0_15, %c0_16] : memref<2x2x8x8xf32, #tpu.memory_space<vmem>>, vector<1x2x8x8xf32>
    %46 = vector.shape_cast %45 : vector<1x2x8x8xf32> to vector<2x8x8xf32>
    %47 = vector.shape_cast %44 : vector<2x8x8xf32> to vector<1x2x8x8xf32>
    tpu.vector_store %arg6[%c0_13, %c0_14, %c0_15, %c0_16], %47 {strides = array<i32>} : memref<2x2x8x8xf32, #tpu.memory_space<vmem>>, vector<1x2x8x8xf32>,
    "tpu.trace_start"() <{level = 10 : i32, message = "bqk,bkd->bqd"}> : () -> ()
    %cst_17 = arith.constant dense<0.000000e+00> : vector<2x8x16xf32>
    %48 = tpu.matmul %44, %33, %cst_17 {dimension_numbers = #tpu.dot_dimension_numbers<[2], [1], [1], [2], [0, 0, 0, 1, 1, 2], [0], [0]>} : vector<2x8x8xf32>, vector<2x8x16xf32>, vector<2x8x16xf32> -> vector<2x8x16xf32>
    "tpu.trace_stop"() : () -> ()
    %49 = vector.shape_cast %48 : vector<2x8x16xf32> to vector<16x16xf32>
    %50 = vector.extract_strided_slice %30 {offsets = [0, 0], sizes = [16, 32], strides = [1, 1]} : vector<32x32xf32> to vector<16x32xf32>
    %cst_18 = arith.constant dense<0.000000e+00> : vector<16x32xf32>
    %51 = tpu.matmul %49, %50, %cst_18 {dimension_numbers = #tpu.dot_dimension_numbers<[1], [0], [0], [1], [0, 0, 1, 1], [], []>} : vector<16x16xf32>, vector<16x32xf32>, vector<16x32xf32> -> vector<16x32xf32>
    %52 = vector.extract_strided_slice %29 {offsets = [0, 0, 16], sizes = [2, 8, 16], strides = [1, 1, 1]} : vector<2x8x96xf32> to vector<2x8x16xf32>
    %53 = vector.extract_strided_slice %29 {offsets = [0, 0, 48], sizes = [2, 8, 16], strides = [1, 1, 1]} : vector<2x8x96xf32> to vector<2x8x16xf32>
    %54 = vector.extract_strided_slice %29 {offsets = [0, 0, 80], sizes = [2, 8, 16], strides = [1, 1, 1]} : vector<2x8x96xf32> to vector<2x8x16xf32>
    "tpu.trace_start"() <{level = 10 : i32, message = "bqd,bkd->bqk"}> : () -> ()
    %cst_19 = arith.constant dense<0.000000e+00> : vector<2x8x8xf32>
    %55 = tpu.matmul %52, %53, %cst_19 {dimension_numbers = #tpu.dot_dimension_numbers<[2], [2], [1], [1], [0, 0, 0, 1, 1, 1], [0], [0]>} : vector<2x8x16xf32>, vector<2x8x16xf32>, vector<2x8x8xf32> -> vector<2x8x8xf32>
    "tpu.trace_stop"() : () -> ()
    %cst_20 = arith.constant dense<0xFF800000> : vector<2x8xf32>
    %56 = vector.multi_reduction <maximumf>, %55, %cst_20 [2] : vector<2x8x8xf32> to vector<2x8xf32>
    %57 = vector.shape_cast %56 : vector<2x8xf32> to vector<2x8x1xf32>
    %58 = vector.broadcast %57 : vector<2x8x1xf32> to vector<2x8x8xf32>
    %59 = arith.subf %55, %58 : vector<2x8x8xf32>
    %60 = math.exp %59 : vector<2x8x8xf32>
    %cst_21 = arith.constant dense<0.000000e+00> : vector<2x8xf32>
    %61 = vector.multi_reduction <add>, %60, %cst_21 [2] : vector<2x8x8xf32> to vector<2x8xf32>
    %62 = vector.shape_cast %61 : vector<2x8xf32> to vector<2x8x1xf32>
    %63 = tpu.reciprocal %62 {approx = true} : vector<2x8x1xf32> -> vector<2x8x1xf32>
    %64 = vector.broadcast %63 : vector<2x8x1xf32> to vector<2x8x8xf32>
    %65 = arith.mulf %60, %64 : vector<2x8x8xf32>
    %c1 = arith.constant 1 : index
    %c0_22 = arith.constant 0 : index
    %c0_23 = arith.constant 0 : index
    %c0_24 = arith.constant 0 : index
    %66 = vector.load %arg6[%c1, %c0_22, %c0_23, %c0_24] : memref<2x2x8x8xf32, #tpu.memory_space<vmem>>, vector<1x2x8x8xf32>
    %67 = vector.shape_cast %66 : vector<1x2x8x8xf32> to vector<2x8x8xf32>
    %68 = vector.shape_cast %65 : vector<2x8x8xf32> to vector<1x2x8x8xf32>
    tpu.vector_store %arg6[%c1, %c0_22, %c0_23, %c0_24], %68 {strides = array<i32>} : memref<2x2x8x8xf32, #tpu.memory_space<vmem>>, vector<1x2x8x8xf32>,
    "tpu.trace_start"() <{level = 10 : i32, message = "bqk,bkd->bqd"}> : () -> ()
    %cst_25 = arith.constant dense<0.000000e+00> : vector<2x8x16xf32>
    %69 = tpu.matmul %65, %54, %cst_25 {dimension_numbers = #tpu.dot_dimension_numbers<[2], [1], [1], [2], [0, 0, 0, 1, 1, 2], [0], [0]>} : vector<2x8x8xf32>, vector<2x8x16xf32>, vector<2x8x16xf32> -> vector<2x8x16xf32>
    "tpu.trace_stop"() : () -> ()
    %70 = vector.shape_cast %69 : vector<2x8x16xf32> to vector<16x16xf32>
    %71 = vector.extract_strided_slice %30 {offsets = [16, 0], sizes = [16, 32], strides = [1, 1]} : vector<32x32xf32> to vector<16x32xf32>
    %cst_26 = arith.constant dense<0.000000e+00> : vector<16x32xf32>
    %72 = tpu.matmul %70, %71, %cst_26 {dimension_numbers = #tpu.dot_dimension_numbers<[1], [0], [0], [1], [0, 0, 1, 1], [], []>} : vector<16x16xf32>, vector<16x32xf32>, vector<16x32xf32> -> vector<16x32xf32>
    %73 = arith.addf %51, %72 : vector<16x32xf32>
    %74 = vector.extract_strided_slice %2 {offsets = [4, 0], sizes = [1, 32], strides = [1, 1]} : vector<8x64xf32> to vector<1x32xf32>
    %75 = vector.broadcast %74 : vector<1x32xf32> to vector<16x32xf32>
    %76 = arith.addf %73, %75 : vector<16x32xf32>
    %77 = arith.addf %76, %0 : vector<16x32xf32>
    %78 = vector.extract_strided_slice %2 {offsets = [2, 0], sizes = [1, 32], strides = [1, 1]} : vector<8x64xf32> to vector<1x32xf32>
    %79 = vector.extract_strided_slice %2 {offsets = [3, 0], sizes = [1, 32], strides = [1, 1]} : vector<8x64xf32> to vector<1x32xf32>
    %cst_27 = arith.constant dense<0.000000e+00> : vector<16xf32>
    %80 = vector.multi_reduction <add>, %77, %cst_27 [1] : vector<16x32xf32> to vector<16xf32>
    %81 = vector.shape_cast %80 : vector<16xf32> to vector<16x1xf32>
    %cst_28 = arith.constant 3.200000e+01 : f32
    %82 = vector.broadcast %cst_28 : f32 to vector<16x1xf32>
    %83 = arith.divf %81, %82 : vector<16x1xf32>
    %84 = vector.broadcast %83 : vector<16x1xf32> to vector<16x32xf32>
    %85 = arith.subf %77, %84 : vector<16x32xf32>
    %86 = arith.mulf %85, %85 : vector<16x32xf32>
    %cst_29 = arith.constant dense<0.000000e+00> : vector<16xf32>
    %87 = vector.multi_reduction <add>, %86, %cst_29 [1] : vector<16x32xf32> to vector<16xf32>
    %88 = vector.shape_cast %87 : vector<16xf32> to vector<16x1xf32>
    %cst_30 = arith.constant 3.200000e+01 : f32
    %89 = vector.broadcast %cst_30 : f32 to vector<16x1xf32>
    %90 = arith.divf %88, %89 : vector<16x1xf32>
    %91 = vector.broadcast %83 : vector<16x1xf32> to vector<16x32xf32>
    %92 = arith.subf %77, %91 : vector<16x32xf32>
    %cst_31 = arith.constant 9.99999997E-7 : f32
    %93 = vector.broadcast %cst_31 : f32 to vector<16x1xf32>
    %94 = arith.addf %90, %93 : vector<16x1xf32>
    %95 = math.rsqrt %94 : vector<16x1xf32>
    %96 = vector.broadcast %95 : vector<16x1xf32> to vector<16x32xf32>
    %97 = arith.mulf %92, %96 : vector<16x32xf32>
    %98 = vector.broadcast %78 : vector<1x32xf32> to vector<16x32xf32>
    %99 = arith.mulf %97, %98 : vector<16x32xf32>
    %100 = vector.broadcast %79 : vector<1x32xf32> to vector<16x32xf32>
    %101 = arith.addf %99, %100 : vector<16x32xf32>
    %102 = vector.extract_strided_slice %1 {offsets = [0, 128], sizes = [32, 64], strides = [1, 1]} : vector<32x192xf32> to vector<32x64xf32>
    %cst_32 = arith.constant dense<0.000000e+00> : vector<16x64xf32>
    %103 = tpu.matmul %101, %102, %cst_32 {dimension_numbers = #tpu.dot_dimension_numbers<[1], [0], [0], [1], [0, 0, 1, 1], [], []>} : vector<16x32xf32>, vector<32x64xf32>, vector<16x64xf32> -> vector<16x64xf32>
    %104 = vector.extract_strided_slice %2 {offsets = [6, 0], sizes = [1, 64], strides = [1, 1]} : vector<8x64xf32> to vector<1x64xf32>
    %105 = vector.broadcast %104 : vector<1x64xf32> to vector<16x64xf32>
    %106 = arith.addf %103, %105 : vector<16x64xf32>
    %cst_33 = arith.constant 5.000000e-01 : f32
    %107 = vector.broadcast %cst_33 : f32 to vector<16x64xf32>
    %108 = arith.mulf %107, %106 : vector<16x64xf32>
    %cst_34 = arith.constant 0.707106769 : f32
    %109 = vector.broadcast %cst_34 : f32 to vector<16x64xf32>
    %110 = arith.mulf %106, %109 : vector<16x64xf32>
    %111 = math.erf %110 : vector<16x64xf32>
    %cst_35 = arith.constant 1.000000e+00 : f32
    %112 = vector.broadcast %cst_35 : f32 to vector<16x64xf32>
    %113 = arith.addf %112, %111 : vector<16x64xf32>
    %114 = arith.mulf %108, %113 : vector<16x64xf32>
    %c0_36 = arith.constant 0 : index
    %c0_37 = arith.constant 0 : index
    %115 = vector.load %arg3[%c0_36, %c0_37] : memref<64x32xf32, #tpu.memory_space<vmem>>, vector<64x32xf32>
    %cst_38 = arith.constant dense<0.000000e+00> : vector<16x32xf32>
    %116 = tpu.matmul %114, %115, %cst_38 {dimension_numbers = #tpu.dot_dimension_numbers<[1], [0], [0], [1], [0, 0, 1, 1], [], []>} : vector<16x64xf32>, vector<64x32xf32>, vector<16x32xf32> -> vector<16x32xf32>
    %117 = vector.extract_strided_slice %2 {offsets = [5, 0], sizes = [1, 32], strides = [1, 1]} : vector<8x64xf32> to vector<1x32xf32>
    %118 = vector.broadcast %117 : vector<1x32xf32> to vector<16x32xf32>
    %119 = arith.addf %116, %118 : vector<16x32xf32>
    %120 = arith.addf %119, %77 : vector<16x32xf32>
    %c0_39 = arith.constant 0 : index
    %c0_40 = arith.constant 0 : index
    %121 = vector.load %arg5[%c0_39, %c0_40] : memref<16x32xf32, #tpu.memory_space<vmem>>, vector<16x32xf32>
    tpu.vector_store %arg5[%c0_39, %c0_40], %120 {strides = array<i32>} : memref<16x32xf32, #tpu.memory_space<vmem>>, vector<16x32xf32>,
    return
  }
  func.func @transform_0(%arg0: i32) -> (i32, i32) {
    %c0_i32 = arith.constant 0 : i32
    %c0_i32_0 = arith.constant 0 : i32
    %c0_i32_1 = arith.constant 0 : i32
    return %c0_i32, %c0_i32_0 : i32, i32
  }
  func.func @transform_1(%arg0: i32) -> (i32, i32) {
    %c0_i32 = arith.constant 0 : i32
    %c0_i32_0 = arith.constant 0 : i32
    %c0_i32_1 = arith.constant 0 : i32
    return %c0_i32, %c0_i32_0 : i32, i32
  }
  func.func @transform_2(%arg0: i32) -> (i32, i32) {
    %c0_i32 = arith.constant 0 : i32
    %c0_i32_0 = arith.constant 0 : i32
    %c0_i32_1 = arith.constant 0 : i32
    return %c0_i32, %c0_i32_0 : i32, i32
  }
  func.func @transform_3(%arg0: i32) -> (i32, i32) {
    %c0_i32 = arith.constant 0 : i32
    %c0_i32_0 = arith.constant 0 : i32
    %c0_i32_1 = arith.constant 0 : i32
    return %c0_i32, %c0_i32_0 : i32, i32
  }
  func.func @transform_4(%arg0: i32) -> (i32, i32) {
    %c0_i32 = arith.constant 0 : i32
    %c0_i32_0 = arith.constant 0 : i32
    %c0_i32_1 = arith.constant 0 : i32
    return %c0_i32, %c0_i32_0 : i32, i32
  }
  func.func @transform_5(%arg0: i32) -> (i32, i32, i32, i32) {
    %c0_i32 = arith.constant 0 : i32
    %c0_i32_0 = arith.constant 0 : i32
    %c0_i32_1 = arith.constant 0 : i32
    %c0_i32_2 = arith.constant 0 : i32
    %c0_i32_3 = arith.constant 0 : i32
    return %c0_i32, %c0_i32_0, %c0_i32_1, %c0_i32_2 : i32, i32, i32, i32
  }
}

</mosaic_0001>

<bundles_post_ra>
// kernel: encoder_layer.1
= control target key start
LH: loop header
LB: loop body
LE: loop exit
PB: predicated region body
PF: predicated region fallthrough
CT: control target
= control target key end

     0   :  { %vm31_vm0 = vcmask 261120   ;;  %s1733_s0 = inlined_call_operand.vmem [shape: f32[16,32], index: 0, kind: input, shape index: {}]   ;;  %s1734_s1 = inlined_call_operand.vmem [shape: f32[32,192], index: 1, kind: input, shape index: {}]   ;;  %s1735_s2 = inlined_call_operand.vmem [shape: f32[64,32], index: 2, kind: input, shape index: {}]   ;;  %s1736_s3 = inlined_call_operand.vmem [shape: f32[8,64], index: 3, kind: input, shape index: {}]   ;;  %s1737_s4 = inlined_call_operand.hbm [shape: f32[16,32], index: 4, kind: output, shape index: {0}]   ;;  %s1738_s5 = inlined_call_operand.vmem [shape: f32[2,2,8,8], index: 5, kind: output, shape index: {1}]  }
   0x1   :  { %v1524_v0 = vld [vmem:[%s1733_s0] sm:$0xff]  ;;  %v1529_v1 = vld [vmem:[%s1733_s0 + $0x8] sm:$0xff] }
   0x2   :  { %11 = vsyncpa [#allocation3], 0  ;;  %v32_v2 = vsel %vm31_vm0, %v1524_v0, 0.0  ;;  %v35_v3 = vsel %vm31_vm0, %v1529_v1, 0.0  ;;  %v1542_v14 = vld [vmem:[%s1734_s1 + $0x30] sm:$0xff]  ;;  %v1547_v15 = vld [vmem:[%s1734_s1 + $0x20] sm:$0xff]  ;;  %v59_v23 = vlaneseq }
   0x3   :  { %33 = vadd.xlane.f32.xlu0 %v32_v2  ;;  %1324 = vmatprep.subr.mxu0 %v1542_v14  ;;  %v1554_v16 = vld [vmem:[%s1734_s1 + $0x10] sm:$0xff]  ;;  %v1563_v17 = vld [vmem:[%s1734_s1] sm:$0xff]  ;;  %v1480_v39 = vmov 0.0   ;;  %vm1481_vm1 = vmmov 0   ;;  %vm155_vm2 = vcmask 130048   ;;  %vm307_vm3 = vcmask 64512  }
   0x4   :  { %1325 = vmatpush3.msra.mxu0 %v1542_v14  ;;  %v1567_v25 = vshrl.u32 %v59_v23, 7  ;;  %v1573_v27 = vld [vmem:[%s1736_s3] sm:$0xff]  ;;  %1340 = vmatprep.subr.mxu1 %v1480_v39  ;;  %s1482_s3 = smov 96   ;;  %s1483_s6 = smov 64   ;;  %vm1148_vm4 = vcmask 523264  }
   0x5   :  { %1326 = vmatprep.subr.mxu0 %v1547_v15  ;;  %1342 = vmatprep.mubr.msk.f32.mxu1 %vm1481_vm1, %v1480_v39  ;;  %s1484_s7 = smov 80   ;;  %s1485_s8 = smov 112  }
   0x6   :  { %1327 = vmatpush3.msra.mxu0 %v1547_v15  ;;  %v61_v26 = vsub.s32 0, %v1567_v25  ;;  %v67_v28 = vsub.s32 1, %v1567_v25  ;;  %s1486_s13 = smov 48   ;;  %s1487_s14 = smov 32  }
   0x7   :  { %36 = vadd.xlane.f32.xlu0 %v35_v3  ;;  %1328 = vmatprep.subr.mxu0 %v1554_v16 }
   0x8   :  { %1329 = vmatpush3.msra.mxu0 %v1554_v16  ;;  %v62_v29 = vrot.slane %v1573_v27, %v61_v26  ;;  %v68_v32 = vrot.slane %v1573_v27, %v67_v28 }
   0x9   :  { %1330 = vmatprep.subr.mxu0 %v1563_v17 }
   0xa   :  { %1331 = vmatpush3.msra.mxu0 %v1563_v17 }
   0xb   :  { %1335 = vmatprep.subr.mxu0 %v1480_v39 }
  0x8c   :  { %v34_v4 = vpop.xlane.xlu0 %33 }
  0x8d   :  { %v39_v5 = vmul.f32 0.03125, %v34_v4 }
  0x8f   :  { %v41_v6 = vsub.f32 %v1524_v0, %v39_v5 }
  0x90   :  { %v37_v7 = vpop.xlane.xlu0 %36 }
  0x91   :  { %v40_v8 = vmul.f32 0.03125, %v37_v7  ;;  %v43_v9 = vmul.f32 %v41_v6, %v41_v6 }
  0x93   :  { %v42_v10 = vsub.f32 %v1529_v1, %v40_v8  ;;  %v45_v11 = vsel %vm31_vm0, %v43_v9, 0.0 }
  0x94   :  { %46 = vadd.xlane.f32.xlu1 %v45_v11 }
  0x95   :  { %v44_v12 = vmul.f32 %v42_v10, %v42_v10 }
  0x97   :  { %v48_v13 = vsel %vm31_vm0, %v44_v12, 0.0 }
  0x98   :  { %49 = vadd.xlane.f32.xlu1 %v48_v13 }
 0x11d   :  { %v47_v18 = vpop.xlane.xlu1 %46 }
 0x11e   :  { %v51_v19 = vmul.f32 0.03125, %v47_v18 }
 0x120   :  { %v53_v20 = vadd.f32 1e-06, %v51_v19 }
 0x121   :  { %v50_v21 = vpop.xlane.xlu1 %49 }
 0x122   :  { %1430 = vrsqrt.f32 %v53_v20  ;;  %v52_v22 = vmul.f32 0.03125, %v50_v21 }
 0x124   :  { %v54_v24 = vadd.f32 1e-06, %v52_v22 }
 0x126   :  { %1432 = vrsqrt.f32 %v54_v24 }
 0x12f   :  { %v1431_v30 = vpop.eup %1430 }
 0x130   :  { %v57_v31 = vmul.f32 %v1431_v30, %v41_v6 }
 0x132   :  { %v63_v33 = vmul.f32 %v62_v29, %v57_v31 }
 0x133   :  { %v1433_v34 = vpop.eup %1432 }
 0x134   :  { %v58_v35 = vmul.f32 %v1433_v34, %v42_v10  ;;  %v69_v36 = vadd.f32 %v68_v32, %v63_v33 }
 0x136   :  { %v64_v37 = vmul.f32 %v62_v29, %v58_v35  ;;  %1332 = vmatprep.mubr.msk.f32.mxu0 %vm31_vm0, %v69_v36 }
 0x138   :  { %v70_v38 = vadd.f32 %v68_v32, %v64_v37 }
 0x13a   :  { %1333 = vmatmul.mubr.msk.f32.vlgmr.msra.gmra.mxu0 %vm31_vm0, %v70_v38 }
 0x13b   :  { %1337 = vmatprep.mubr.msk.f32.mxu0 %vm1481_vm1, %v1480_v39 }
 0x1fa   :  { %v1586_v40 = vpop.f32.mrf.mxu0 }
 0x1fb   :  { %231 = vrot.lane.b32.xlu1 %v1586_v40, %s1482_s3 }
 0x1fc   :  { %v1589_v41 = vpop.f32.mrf.mxu0 }
 0x1fd   :  { %153 = vrot.lane.b32.xlu0 %v1589_v41, %s1482_s3 }
 0x26d   :  { %v232_v42 = vpop.permute.xlu1 %231 }
 0x26e   :  { %1341 = vmatpush3.xpose.msk.msra.mxu1 %vm155_vm2, %v232_v42 }
 0x26f   :  { %v154_v43 = vpop.permute.xlu0 %153  ;;  %1350 = vmatprep.subr.mxu1 %v1480_v39 }
 0x270   :  { %1336 = vmatpush3.xpose.msk.msra.mxu0 %vm155_vm2, %v154_v43 }
 0x271   :  { %1343 = vmatmul.mubr.msk.f32.vlgmr.msra.gmra.mxu1 %vm155_vm2, %v1586_v40  ;;  %1345 = vmatprep.subr.mxu0 %v1480_v39 }
 0x272   :  { %1352 = vmatprep.mubr.msk.f32.mxu1 %vm1481_vm1, %v1480_v39 }
 0x273   :  { %1338 = vmatmul.mubr.msk.f32.vlgmr.msra.gmra.mxu0 %vm155_vm2, %v1589_v41 }
 0x274   :  { %1347 = vmatprep.mubr.msk.f32.mxu0 %vm1481_vm1, %v1480_v39 }
 0x331   :  { %v303_v44 = vpop.f32.mrf.mxu1 }
 0x332   :  { %v311_v45 = vsel %vm307_vm3, %v303_v44, -inf }
 0x333   :  { %v1344_v46 = vpop.f32.mrf.mxu1  ;;  %312 = vmax.xlane.f32.xlu0 %v311_v45  ;;  %v226_v47 = vpop.f32.mrf.mxu0 }
 0x334   :  { %v308_v48 = vsel %vm307_vm3, %v226_v47, -inf }
 0x335   :  { %309 = vmax.xlane.f32.xlu1 %v308_v48  ;;  %v1339_v49 = vpop.f32.mrf.mxu0  ;;  %v997_v48 = vsub.s32 4, %v1567_v25 }
 0x3bc   :  { %v313_v50 = vpop.xlane.xlu0 %312 }
 0x3bd   :  { %v315_v51 = vsub.f32 %v303_v44, %v313_v50  ;;  %v998_v50 = vrot.slane %v1573_v27, %v997_v48 }
 0x3be   :  { %v310_v52 = vpop.xlane.xlu1 %309 }
 0x3bf   :  { %v318_v53 = vmul.f32 1.442695, %v315_v51  ;;  %v314_v54 = vsub.f32 %v226_v47, %v310_v52 }
 0x3c1   :  { %1434 = vpow2.f32 %v318_v53  ;;  %v316_v55 = vmul.f32 1.442695, %v314_v54 }
 0x3c3   :  { %1436 = vpow2.f32 %v316_v55 }
 0x3ce   :  { %v1435_v56 = vpop.eup %1434 }
 0x3cf   :  { %v323_v57 = vsel %vm307_vm3, %v1435_v56, 0.0 }
 0x3d0   :  { %v1437_v58 = vpop.eup %1436  ;;  %324 = vadd.xlane.f32.xlu1 %v323_v57 }
 0x3d1   :  { %v320_v59 = vsel %vm307_vm3, %v1437_v58, 0.0 }
 0x3d2   :  { %321 = vadd.xlane.f32.xlu0 %v320_v59 }
 0x3e1   :  { %408 = vrot.lane.b32.xlu1 %v1586_v40, %s1483_s6 }
 0x3e5   :  { %486 = vrot.lane.b32.xlu1 %v1589_v41, %s1484_s7 }
 0x3e8   :  { %332 = vrot.lane.b32.xlu0 %v1589_v41, %s1483_s6 }
 0x3e9   :  { %564 = vrot.lane.b32.xlu1 %v1586_v40, %s1484_s7 }
 0x3ec   :  { %484 = vrot.lane.b32.xlu0 %v1589_v41, %s1485_s8 }
 0x3ed   :  { %562 = vrot.lane.b32.xlu1 %v1586_v40, %s1485_s8 }
 0x459   :  { %v325_v60 = vpop.xlane.xlu1 %324 }
 0x45a   :  { %1438 = vrcp.f32 %v325_v60 }
 0x45b   :  { %v322_v61 = vpop.xlane.xlu0 %321 }
 0x45c   :  { %1440 = vrcp.f32 %v322_v61 }
 0x45d   :  { %v409_v62 = vpop.permute.xlu1 %408 }
 0x45e   :  { %1351 = vmatpush3.msra.mxu1 %v409_v62 }
 0x45f   :  { %v333_v63 = vpop.permute.xlu0 %332  ;;  %1360 = vmatprep.subr.mxu1 %v1480_v39 }
 0x460   :  { %1346 = vmatpush3.msra.mxu0 %v333_v63 }
 0x461   :  { %v487_v2 = vpop.permute.xlu1 %486  ;;  %1355 = vmatprep.subr.mxu0 %v1480_v39 }
 0x463   :  { %v485_v9 = vpop.permute.xlu0 %484 }
 0x465   :  { %v565_v4 = vpop.permute.xlu1 %564 }
 0x467   :  { %v1439_v3 = vpop.eup %1438 }
 0x468   :  { %v329_v5 = vmul.f32 %v1439_v3, %v1435_v56 }
 0x469   :  { %v1441_v6 = vpop.eup %1440  ;;  %v563_v8 = vpop.permute.xlu1 %562 }
 0x46a   :  { %331 = vst.msk [vmem:[%s1738_s5 + $0x8] sm:$0xff] %vm307_vm3, %v329_v5  ;;  %1353 = vmatmul.mubr.msk.f32.vlgmr.msra.gmra.mxu1 %vm307_vm3, %v329_v5  ;;  %v328_v7 = vmul.f32 %v1441_v6, %v1437_v58 }
 0x46b   :  { %1361 = vmatpush3.xpose.msk.msra.mxu1 %vm155_vm2, %v565_v4  ;;  %1362 = vmatprep.mubr.msk.f32.mxu1 %vm1481_vm1, %v1480_v39 }
 0x46c   :  { %330 = vst.msk [vmem:[%s1738_s5] sm:$0xff] %vm307_vm3, %v328_v7  ;;  %1348 = vmatmul.mubr.msk.f32.vlgmr.msra.gmra.mxu0 %vm307_vm3, %v328_v7  ;;  %1370 = vmatprep.subr.mxu1 %v1480_v39 }
 0x46d   :  { %1356 = vmatpush3.xpose.msk.msra.mxu0 %vm155_vm2, %v487_v2  ;;  %1357 = vmatprep.mubr.msk.f32.mxu0 %vm1481_vm1, %v1480_v39 }
 0x46e   :  { %1363 = vmatmul.mubr.msk.f32.vlgmr.msra.gmra.mxu1 %vm155_vm2, %v563_v8  ;;  %1365 = vmatprep.subr.mxu0 %v1480_v39  ;;  %v29_v8 = vld [vmem:[%s1734_s1 + $0x38] sm:$0xff] }
 0x46f   :  { %1372 = vmatprep.mubr.msk.f32.mxu1 %vm1481_vm1, %v1480_v39 }
 0x470   :  { %1358 = vmatmul.mubr.msk.f32.vlgmr.msra.gmra.mxu0 %vm155_vm2, %v485_v9  ;;  %v27_v9 = vld [vmem:[%s1734_s1 + $0x28] sm:$0xff] }
 0x471   :  { %1367 = vmatprep.mubr.msk.f32.mxu0 %vm1481_vm1, %v1480_v39 }
 0x52a   :  { %v480_v10 = vpop.f32.mrf.mxu1 }
 0x52c   :  { %v404_v11 = vpop.f32.mrf.mxu0  ;;  %v1354_v12 = vpop.f32.mrf.mxu1 }
 0x52e   :  { %v1349_v13 = vpop.f32.mrf.mxu0  ;;  %v636_v18 = vpop.f32.mrf.mxu1 }
 0x52f   :  { %v643_v19 = vsel %vm307_vm3, %v636_v18, -inf }
 0x530   :  { %644 = vmax.xlane.f32.xlu1 %v643_v19  ;;  %v558_v20 = vpop.f32.mrf.mxu0  ;;  %v1364_v21 = vpop.f32.mrf.mxu1 }
 0x531   :  { %v640_v22 = vsel %vm307_vm3, %v558_v20, -inf }
 0x532   :  { %641 = vmax.xlane.f32.xlu0 %v640_v22  ;;  %v1359_v23 = vpop.f32.mrf.mxu0  ;;  %v1031_v22 = vsub.s32 2, %v1567_v25 }
 0x533   :  { %v1037_v23 = vsub.s32 3, %v1567_v25 }
 0x541   :  { %741 = vrot.lane.b32.xlu1 %v1586_v40, %s1486_s13 }
 0x545   :  { %821 = vrot.lane.b32.xlu1 %v1542_v14, %s1487_s14 }
 0x549   :  { %910 = vrot.lane.b32.xlu1 %v1554_v16, %s1487_s14 }
 0x54d   :  { %908 = vrot.lane.b32.xlu1 %v1563_v17, %s1487_s14 }
 0x5b9   :  { %v645_v24 = vpop.xlane.xlu1 %644 }
 0x5ba   :  { %v647_v26 = vsub.f32 %v636_v18, %v645_v24  ;;  %v1032_v24 = vrot.slane %v1573_v27, %v1031_v22 }
 0x5bb   :  { %v642_v28 = vpop.xlane.xlu0 %641 }
 0x5bc   :  { %v650_v29 = vmul.f32 1.442695, %v647_v26  ;;  %v646_v30 = vsub.f32 %v558_v20, %v642_v28 }
 0x5bd   :  { %v742_v31 = vpop.permute.xlu1 %741 }
 0x5be   :  { %1442 = vpow2.f32 %v650_v29  ;;  %v648_v32 = vmul.f32 1.442695, %v646_v30  ;;  %1371 = vmatpush3.msra.mxu1 %v742_v31  ;;  %v1038_v29 = vrot.slane %v1573_v27, %v1037_v23 }
 0x5c0   :  { %1444 = vpow2.f32 %v648_v32 }
 0x5c1   :  { %v822_v16 = vpop.permute.xlu1 %821 }
 0x5c5   :  { %v911_v17 = vpop.permute.xlu1 %910 }
 0x5c6   :  { %1382 = vmatprep.subr.mxu1 %v911_v17 }
 0x5c9   :  { %v909_v42 = vpop.permute.xlu1 %908 }
 0x5cb   :  { %v1443_v33 = vpop.eup %1442 }
 0x5cc   :  { %v655_v34 = vsel %vm307_vm3, %v1443_v33, 0.0 }
 0x5cd   :  { %v1445_v35 = vpop.eup %1444  ;;  %656 = vadd.xlane.f32.xlu0 %v655_v34 }
 0x5ce   :  { %v652_v14 = vsel %vm307_vm3, %v1445_v35, 0.0 }
 0x5d1   :  { %653 = vadd.xlane.f32.xlu0 %v652_v14  ;;  %v1143_v14 = vld [vmem:[%s1735_s2 + $0x38] sm:$0xff] }
 0x5e7   :  { %665 = vrot.lane.b32.xlu0 %v1589_v41, %s1486_s13 }
 0x5eb   :  { %819 = vrot.lane.b32.xlu0 %v1547_v15, %s1487_s14 }
 0x656   :  { %v657_v36 = vpop.xlane.xlu0 %656 }
 0x657   :  { %1446 = vrcp.f32 %v657_v36  ;;  %v1140_v36 = vld [vmem:[%s1735_s2 + $0x20] sm:$0xff] }
 0x65a   :  { %v654_v37 = vpop.xlane.xlu0 %653 }
 0x65b   :  { %1448 = vrcp.f32 %v654_v37  ;;  %v1139_v37 = vld [vmem:[%s1735_s2 + $0x18] sm:$0xff] }
 0x65e   :  { %v666_v38 = vpop.permute.xlu0 %665 }
 0x65f   :  { %1366 = vmatpush3.msra.mxu0 %v666_v38  ;;  %v1138_v38 = vld [vmem:[%s1735_s2 + $0x10] sm:$0xff] }
 0x660   :  { %1375 = vmatprep.subr.mxu0 %v822_v16 }
 0x662   :  { %v820_v43 = vpop.permute.xlu0 %819 }
 0x664   :  { %v1447_v39 = vpop.eup %1446 }
 0x665   :  { %v661_v40 = vmul.f32 %v1447_v39, %v1443_v33  ;;  %v1137_v39 = vld [vmem:[%s1735_s2 + $0x8] sm:$0xff] }
 0x667   :  { %1267 = vst.msk [vmem:[%s1738_s5 + $0x18] sm:$0xff] %vm307_vm3, %v661_v40  ;;  %1373 = vmatmul.mubr.msk.f32.vlgmr.msra.gmra.mxu1 %vm307_vm3, %v661_v40  ;;  %v1136_v40 = vld [vmem:[%s1735_s2] sm:$0xff] }
 0x668   :  { %v1449_v41 = vpop.eup %1448  ;;  %1383 = vmatpush3.msra.mxu1 %v911_v17  ;;  %1386 = vmatprep.mubr.msk.f32.mxu1 %vm155_vm2, %v404_v11  ;;  %v23_v11 = vld [vmem:[%s1734_s1 + $0x8] sm:$0xff] }
 0x669   :  { %1384 = vmatprep.subr.mxu1 %v909_v42  ;;  %v660_v15 = vmul.f32 %v1449_v41, %v1445_v35  ;;  %v1141_v17 = vld [vmem:[%s1735_s2 + $0x28] sm:$0xff] }
 0x66a   :  { %1385 = vmatpush3.msra.mxu1 %v909_v42  ;;  %v1043_v42 = vsub.s32 6, %v1567_v25 }
 0x66b   :  { %1266 = vst.msk [vmem:[%s1738_s5 + $0x10] sm:$0xff] %vm307_vm3, %v660_v15  ;;  %1368 = vmatmul.mubr.msk.f32.vlgmr.msra.gmra.mxu0 %vm307_vm3, %v660_v15  ;;  %1387 = vmatmul.mubr.msk.f32.vlgmr.msra.gmra.mxu1 %vm155_vm2, %v480_v10  ;;  %v25_v10 = vld [vmem:[%s1734_s1 + $0x18] sm:$0xff] }
 0x66c   :  { %1376 = vmatpush3.msra.mxu0 %v822_v16  ;;  %1400 = vmatprep.subr.mxu1 %v1143_v14  ;;  %v1142_v16 = vld [vmem:[%s1735_s2 + $0x30] sm:$0xff]  ;;  %v1044_v41 = vrot.slane %v1573_v27, %v1043_v42  ;;  %s1488_s2 = smov [#allocation2]  }
 0x66d   :  { %1377 = vmatprep.subr.mxu0 %v820_v43  ;;  %1401 = vmatpush3.msra.mxu1 %v1143_v14  ;;  %s1239_s14 = sshll.u32 %s1488_s2, 4  ;;  %s1240_s14 = int_to_ptr.vmem [resolvable:$true] %s1239_s14 }
 0x66e   :  { %1378 = vmatpush3.msra.mxu0 %v820_v43  ;;  %1402 = vmatprep.subr.mxu1 %v1142_v16  ;;  %s1458_s15 = scalar_lea.vmem %s1240_s14, 256  ;;  %p1463_p1 = scmp.lt.s32.totalorder %s1240_s14, %s1240_s14 }
 0x66f   :  { %1389 = vmatprep.subr.mxu0 %v29_v8  ;;  %1403 = vmatpush3.msra.mxu1 %v1142_v16  ;;  %p1459_p0 = scmp.ne.s32.totalorder %s1240_s14, %s1458_s15  ;;  %p1464_p2 = scmp.lt.s32.totalorder %s1458_s15, %s1458_s15 }
 0x670   :  { %1404 = vmatprep.subr.mxu1 %v1141_v17 }
 0x671   :  { %1405 = vmatpush3.msra.mxu1 %v1141_v17  ;;  %p1465_p3 = por %p1464_p2, %p1463_p1 }
 0x672   :  { %1406 = vmatprep.subr.mxu1 %v1140_v36 }
 0x673   :  { %1407 = vmatpush3.msra.mxu1 %v1140_v36  ;;  %p1466_p4 = pnand %p1465_p3, %p1459_p0 }
 0x674   :  { %1408 = vmatprep.subr.mxu1 %v1139_v37 }
 0x675   :  { %1409 = vmatpush3.msra.mxu1 %v1139_v37 }
 0x676   :  { %1410 = vmatprep.subr.mxu1 %v1138_v38 }
 0x677   :  { %1411 = vmatpush3.msra.mxu1 %v1138_v38 }
 0x678   :  { %1412 = vmatprep.subr.mxu1 %v1137_v39 }
 0x679   :  { %1413 = vmatpush3.msra.mxu1 %v1137_v39 }
 0x67a   :  { %1414 = vmatprep.subr.mxu1 %v1136_v40 }
 0x67b   :  { %1415 = vmatpush3.msra.mxu1 %v1136_v40 }
 0x727   :  { %v813_v44 = vpop.f32.mrf.mxu1 }
 0x729   :  { %v1374_v45 = vpop.f32.mrf.mxu1 }
 0x72b   :  { %v737_v46 = vpop.f32.mrf.mxu0  ;;  %v1388_v49 = vpop.f32.mrf.mxu1 }
 0x72c   :  { %1379 = vmatprep.mubr.msk.f32.mxu0 %vm155_vm2, %v737_v46 }
 0x72d   :  { %v1369_v47 = vpop.f32.mrf.mxu0  ;;  %1380 = vmatmul.mubr.msk.f32.vlgmr.msra.gmra.mxu0 %vm155_vm2, %v813_v44  ;;  %v986_v53 = vpop.f32.mrf.mxu1 }
 0x72e   :  { %1390 = vmatpush3.msra.mxu0 %v29_v8 }
 0x72f   :  { %1391 = vmatprep.subr.mxu0 %v27_v9 }
 0x730   :  { %1392 = vmatpush3.msra.mxu0 %v27_v9 }
 0x731   :  { %1393 = vmatprep.subr.mxu0 %v25_v10 }
 0x732   :  { %1394 = vmatpush3.msra.mxu0 %v25_v10 }
 0x733   :  { %1395 = vmatprep.subr.mxu0 %v23_v11 }
 0x734   :  { %1396 = vmatpush3.msra.mxu0 %v23_v11 }
 0x7ed   :  { %v1381_v51 = vpop.f32.mrf.mxu0 }
 0x7ee   :  { %v992_v52 = vadd.f32 %v1388_v49, %v1381_v51 }
 0x7ef   :  { %v897_v54 = vpop.f32.mrf.mxu0 }
 0x7f0   :  { %v1000_v55 = vadd.f32 %v998_v50, %v992_v52  ;;  %v987_v56 = vadd.f32 %v986_v53, %v897_v54 }
 0x7f2   :  { %v1667_v57 = vadd.f32 %v1000_v55, %v1529_v1  ;;  %v999_v58 = vadd.f32 %v998_v50, %v987_v56  ;;  %v1146_v56 = vsub.s32 5, %v1567_v25 }
 0x7f4   :  { %v1670_v59 = vadd.f32 %v999_v58, %v1524_v0  ;;  %v1006_v60 = vsel %vm31_vm0, %v1667_v57, 0.0  ;;  %v1147_v58 = vrot.slane %v1573_v27, %v1146_v56 }
 0x7f5   :  { %1007 = vadd.xlane.f32.xlu1 %v1006_v60 }
 0x7f6   :  { %v1003_v61 = vsel %vm31_vm0, %v1670_v59, 0.0 }
 0x7f7   :  { %1004 = vadd.xlane.f32.xlu0 %v1003_v61 }
 0x87e   :  { %v1008_v62 = vpop.xlane.xlu1 %1007 }
 0x87f   :  { %v1010_v63 = vmul.f32 0.03125, %v1008_v62 }
 0x880   :  { %v1005_v2 = vpop.xlane.xlu0 %1004 }
 0x881   :  { %v1009_v3 = vmul.f32 0.03125, %v1005_v2  ;;  %v1012_v4 = vsub.f32 %v1667_v57, %v1010_v63 }
 0x883   :  { %v1011_v1 = vsub.f32 %v1670_v59, %v1009_v3  ;;  %v1014_v6 = vmul.f32 %v1012_v4, %v1012_v4 }
 0x885   :  { %v1013_v5 = vmul.f32 %v1011_v1, %v1011_v1  ;;  %v1018_v7 = vsel %vm31_vm0, %v1014_v6, 0.0 }
 0x887   :  { %v1015_v0 = vsel %vm31_vm0, %v1013_v5, 0.0 }
 0x888   :  { %1016 = vadd.xlane.f32.xlu0 %v1015_v0 }
 0x88c   :  { %1019 = vadd.xlane.f32.xlu0 %v1018_v7 }
 0x911   :  { %v1017_v12 = vpop.xlane.xlu0 %1016 }
 0x912   :  { %v1021_v13 = vmul.f32 0.03125, %v1017_v12 }
 0x914   :  { %v1023_v18 = vadd.f32 1e-06, %v1021_v13 }
 0x915   :  { %v1020_v19 = vpop.xlane.xlu0 %1019 }
 0x916   :  { %1450 = vrsqrt.f32 %v1023_v18  ;;  %v1022_v20 = vmul.f32 0.03125, %v1020_v19 }
 0x918   :  { %v1024_v21 = vadd.f32 1e-06, %v1022_v20 }
 0x91a   :  { %1452 = vrsqrt.f32 %v1024_v21 }
 0x923   :  { %v1451_v26 = vpop.eup %1450 }
 0x924   :  { %v1027_v28 = vmul.f32 %v1451_v26, %v1011_v1 }
 0x926   :  { %v1033_v30 = vmul.f32 %v1032_v24, %v1027_v28 }
 0x927   :  { %v1453_v31 = vpop.eup %1452 }
 0x928   :  { %v1028_v32 = vmul.f32 %v1453_v31, %v1012_v4  ;;  %v1039_v33 = vadd.f32 %v1038_v29, %v1033_v30 }
 0x92a   :  { %v1034_v34 = vmul.f32 %v1032_v24, %v1028_v32  ;;  %1397 = vmatprep.mubr.msk.f32.mxu0 %vm31_vm0, %v1039_v33 }
 0x92c   :  { %v1040_v35 = vadd.f32 %v1038_v29, %v1034_v34 }
 0x92e   :  { %1398 = vmatmul.mubr.msk.f32.vlgmr.msra.gmra.mxu0 %vm31_vm0, %v1040_v35 }
 0x9ee   :  { %v1399_v15 = vpop.f32.mrf.mxu0 }
 0x9ef   :  { %v1123_v43 = vadd.f32 %v1399_v15, %v1044_v41 }
 0x9f0   :  { %v1117_v44 = vpop.f32.mrf.mxu0 }
 0x9f1   :  { %v1129_v45 = vmul.f32 0.70710677, %v1123_v43  ;;  %v1118_v46 = vadd.f32 %v1117_v44, %v1044_v41  ;;  %v1127_v53 = vmul.f32 0.5, %v1123_v43 }
 0x9f3   :  { %1454 = verf.f32 %v1129_v45  ;;  %v1128_v47 = vmul.f32 0.70710677, %v1118_v46  ;;  %v1126_v51 = vmul.f32 0.5, %v1118_v46 }
 0x9f5   :  { %1456 = verf.f32 %v1128_v47 }
 0xa00   :  { %v1455_v48 = vpop.eup %1454 }
 0xa01   :  { %v1133_v50 = vadd.f32 1.0, %v1455_v48 }
 0xa02   :  { %v1457_v49 = vpop.eup %1456 }
 0xa03   :  { %v1132_v52 = vadd.f32 1.0, %v1457_v49  ;;  %v1135_v55 = vmul.f32 %v1133_v50, %v1127_v53 }
 0xa05   :  { %v1134_v54 = vmul.f32 %v1132_v52, %v1126_v51 }
 0xa07   :  { %1416 = vmatprep.mubr.msk.f32.mxu1 %vm1148_vm4, %v1134_v54 }
 0xa08   :  { %1417 = vmatmul.mubr.msk.f32.vlgmr.msra.gmra.mxu1 %vm1148_vm4, %v1135_v55 }
 0xac8   :  { %v1418_v60 = vpop.f32.mrf.mxu1 }
 0xac9   :  { %v1227_v61 = vadd.f32 %v1418_v60, %v1147_v58 }
 0xaca   :  { %v1221_v62 = vpop.f32.mrf.mxu1 }
 0xacb   :  { %v1231_v63 = vadd.f32 %v1227_v61, %v1667_v57  ;;  %v1222_v2 = vadd.f32 %v1221_v62, %v1147_v58 }
 0xacd   :  { %1233 = vst.msk [vmem:[#allocation2 + $0x8] sm:$0xff] %vm31_vm0, %v1231_v63  ;;  %v1230_v3 = vadd.f32 %v1222_v2, %v1670_v59 }
 0xacf   :  { %1232 = vst.msk [vmem:[#allocation2] sm:$0xff] %vm31_vm0, %v1230_v3 }
 0xad0   :  { %1469 = shalt.err (!%p1466_p4)
}
 0xad1   :  { %s1489_s16 = smov 128   ;;  %s1490_s17 = smov 8  }
 0xad2   :  { %1245 = dma.vmem_to_hbm [thread:$0]  %s1240_s14, 256, %s1737_s4, [#allocation3], %s1489_s16, %s1489_s16, %s1490_s17  }
 0xad3   :  { %1478 = dma.done.wait [#allocation3], 256  }
 0xad4   :  { %1479 = vsyncadd [#allocation3], 4294967040 }
 0xad5   :  { %1253 = vsyncpa [#allocation3], 1 }

</bundles_post_ra>
